<compile_context>
chip_gen: v5e
topology: v5e:2x2
jax: 0.10.0
libtpu: 0.0.40
codegen_flags: <defaults>
</compile_context>

<pallas_src>
import functools
import math

import jax
import jax.numpy as jnp
from jax import lax
from jax.experimental import pallas as pl
from jax.experimental.pallas import tpu as pltpu

LANE = 128


def _round_up(x, m):
    return (x + m - 1) // m * m


def _pick_tile(n, target):
    """Largest tile <= target that divides n (keeps specs (8,128)-friendly)."""
    t = min(target, n)
    while n % t:
        t -= 1
    return t


# ---------------------------------------------------------------------------
# Single-step cell (exactly CIFGCell.forward):
#   gates = x @ Wx + hx @ Wh + b   (two K-split bf16 MXU dots, f32 acc)
# ---------------------------------------------------------------------------
def cifg_cell_kernel(x_ref, hx_ref, cx_ref, wx_ref, wh_ref, b_ref,
                     hy_ref, cy_ref, *, hp, h):
    dt = wx_ref.dtype
    gates = (jnp.dot(x_ref[...].astype(dt), wx_ref[...],
                     preferred_element_type=jnp.float32)
             + jnp.dot(hx_ref[...].astype(dt), wh_ref[...],
                       preferred_element_type=jnp.float32)
             + b_ref[...])
    # Gate blocks start at 128-lane-aligned offsets (Hp-padded layout).
    ingate = jax.nn.sigmoid(gates[:, 0 * hp:0 * hp + h])
    gategate = jnp.tanh(gates[:, 1 * hp:1 * hp + h])
    outgate = jax.nn.sigmoid(gates[:, 2 * hp:2 * hp + h])

    cx = cx_ref[...].astype(jnp.float32)
    cy = (1.0 - ingate) * cx + ingate * gategate
    hy = outgate * jnp.tanh(cy)
    cy_ref[...] = cy.astype(cy_ref.dtype)
    hy_ref[...] = hy.astype(hy_ref.dtype)


def cifg_cell(x, hx, cx, wx_p, wh_k, b_p, hidden_size):
    """One CIFG step. wx_p: (I,3Hp) bf16, wh_k: (H,3Hp) bf16, b_p: (1,3Hp) f32."""
    B = x.shape[0]
    Hp = b_p.shape[-1] // 3
    vmem = pl.BlockSpec(memory_space=pltpu.MemorySpace.VMEM)
    hy, cy = pl.pallas_call(
        functools.partial(cifg_cell_kernel, hp=Hp, h=hidden_size),
        out_shape=(jax.ShapeDtypeStruct((B, hidden_size), jnp.float32),
                   jax.ShapeDtypeStruct((B, hidden_size), jnp.float32)),
        in_specs=[vmem] * 6,
        out_specs=(vmem, vmem),
    )(x, hx, cx, wx_p, wh_k, b_p)
    return hy, cy


# ---------------------------------------------------------------------------
# Sequence variant: chunked time grid, resident Wh, bf16 streamed I/O.
# ---------------------------------------------------------------------------
def input_proj_kernel(x_ref, wx_ref, b_ref, o_ref):
    o_ref[...] = (jnp.dot(x_ref[...].astype(wx_ref.dtype), wx_ref[...],
                          preferred_element_type=jnp.float32)
                  + b_ref[...]).astype(o_ref.dtype)


def cifg_seq_kernel(xp_ref, h0_ref, c0_ref, wh_ref, hy_ref, cy_ref,
                    h_s, c_s, wh_s, sem, *, hp, tt, bt):
    b = pl.program_id(0)
    tc = pl.program_id(1)

    @pl.when(tc == 0)
    def _():
        def copy(src, dst):
            cp = pltpu.make_async_copy(src, dst, sem)
            cp.start()
            cp.wait()
        row = b * bt
        copy(h0_ref.at[pl.ds(row, bt), :], h_s)   # one-shot: no per-step DMA
        copy(c0_ref.at[pl.ds(row, bt), :], c_s)
        copy(wh_ref, wh_s)                        # single resident copy of Wh

    def step(i, carry):
        gates = xp_ref[i].astype(jnp.float32) + jnp.dot(
            h_s[...].astype(wh_s.dtype), wh_s[...],
            preferred_element_type=jnp.float32)
        ingate = jax.nn.sigmoid(gates[:, 0 * hp:1 * hp])
        gategate = jnp.tanh(gates[:, 1 * hp:2 * hp])
        outgate = jax.nn.sigmoid(gates[:, 2 * hp:3 * hp])
        cy = (1.0 - ingate) * c_s[...] + ingate * gategate
        hy = outgate * jnp.tanh(cy)
        h_s[...] = hy
        c_s[...] = cy
        hy_ref[i] = hy.astype(hy_ref.dtype)
        cy_ref[i] = cy.astype(cy_ref.dtype)
        return carry

    lax.fori_loop(0, tt, step, 0, unroll=True)


def cifg_sequence(xs, h0, c0, wx_p, wh_p, b_p, hidden_size,
                  *, t_chunk=8, batch_tile=None, out_dtype=jnp.bfloat16):
    """Run the cell over xs: (T, B, I). Returns (T, B, H) hy, cy (bf16)."""
    T, B, I = xs.shape
    Hp = wh_p.shape[0]

    # --- 1) input projection for all timesteps, tiled over M = T*B rows ---
    M = T * B
    TM = _pick_tile(M, 256)
    xp = pl.pallas_call(
        input_proj_kernel,
        out_shape=jax.ShapeDtypeStruct((M, 3 * Hp), out_dtype),
        grid=(M // TM,),
        in_specs=[pl.BlockSpec((TM, I), lambda m: (m, 0)),
                  pl.BlockSpec((I, 3 * Hp), lambda m: (0, 0)),
                  pl.BlockSpec((1, 3 * Hp), lambda m: (0, 0))],
        out_specs=pl.BlockSpec((TM, 3 * Hp), lambda m: (m, 0)),
        compiler_params=pltpu.CompilerParams(
            dimension_semantics=("parallel",),
            vmem_limit_bytes=32 * 1024 * 1024),
    )(xs.reshape(M, I), wx_p, b_p)
    xp = xp.reshape(T, B, 3 * Hp)

    # --- 2) recurrence: grid = (batch tiles [parallel], T chunks [arbitrary]) ---
    TT = _pick_tile(T, t_chunk)
    BT = batch_tile if batch_tile is not None else B
    assert B % BT == 0 and (BT % 8 == 0 or BT == B)
    NB = B // BT

    h0_p = jnp.pad(h0.astype(jnp.float32), ((0, 0), (0, Hp - hidden_size)))
    c0_p = jnp.pad(c0.astype(jnp.float32), ((0, 0), (0, Hp - hidden_size)))

    hbm = pl.BlockSpec(memory_space=pl.ANY)
    hy, cy = pl.pallas_call(
        functools.partial(cifg_seq_kernel, hp=Hp, tt=TT, bt=BT),
        out_shape=(jax.ShapeDtypeStruct((T, B, Hp), out_dtype),
                   jax.ShapeDtypeStruct((T, B, Hp), out_dtype)),
        grid=(NB, T // TT),
        in_specs=[
            pl.BlockSpec((TT, BT, 3 * Hp), lambda b, t: (t, b, 0)),  # xp stream
            hbm,   # h0: one-shot DMA at t-chunk 0
            hbm,   # c0: one-shot DMA at t-chunk 0
            hbm,   # Wh: single resident VMEM copy
        ],
        out_specs=(
            pl.BlockSpec((TT, BT, Hp), lambda b, t: (t, b, 0)),
            pl.BlockSpec((TT, BT, Hp), lambda b, t: (t, b, 0)),
        ),
        scratch_shapes=[
            pltpu.VMEM((BT, Hp), jnp.float32),       # h state (f32, persists)
            pltpu.VMEM((BT, Hp), jnp.float32),       # c state (f32, persists)
            pltpu.VMEM((Hp, 3 * Hp), wh_p.dtype),    # resident Wh
            pltpu.SemaphoreType.DMA(()),
        ],
        compiler_params=pltpu.CompilerParams(
            dimension_semantics=("parallel", "arbitrary"),
            vmem_limit_bytes=32 * 1024 * 1024),
    )(xp, h0_p, c0_p, wh_p)
    return hy[:, :, :hidden_size], cy[:, :, :hidden_size]


# ---------------------------------------------------------------------------
# Parameter init / packing / references
# ---------------------------------------------------------------------------
def init_params(key, input_size, hidden_size):
    """Matches CIFGCell.reset_parameters: uniform(-std, std), std=1/sqrt(H)."""
    std = 1.0 / math.sqrt(hidden_size)
    k1, k2, k3, k4 = jax.random.split(key, 4)
    wx = jax.random.uniform(k1, (3 * hidden_size, input_size),
                            jnp.float32, -std, std).T          # (I, 3H)
    bx = jax.random.uniform(k2, (3 * hidden_size,), jnp.float32, -std, std)
    wh = jax.random.uniform(k3, (3 * hidden_size, hidden_size),
                            jnp.float32, -std, std).T          # (H, 3H)
    bh = jax.random.uniform(k4, (3 * hidden_size,), jnp.float32, -std, std)
    return wx, wh, bx + bh


def pack_params(wx, wh, b, hidden_size, dtype=jnp.bfloat16):
    """Pad each gate block to a 128-lane boundary (zero pad columns)."""
    Hp = _round_up(hidden_size, LANE)
    pad = Hp - hidden_size

    def pad_gate_cols(a):  # (K, 3H) -> (K, 3Hp), zero-filled pad lanes
        k = a.shape[0]
        return jnp.pad(a.reshape(k, 3, hidden_size),
                       ((0, 0), (0, 0), (0, pad))).reshape(k, 3 * Hp)

    wx_p = pad_gate_cols(wx).astype(dtype)                               # (I, 3Hp)
    wh_k = pad_gate_cols(wh).astype(dtype)                               # (H, 3Hp)
    wh_p = jnp.pad(pad_gate_cols(wh), ((0, pad), (0, 0))).astype(dtype)  # (Hp, 3Hp)
    b_p = jnp.pad(b.reshape(3, hidden_size),
                  ((0, 0), (0, pad))).reshape(1, 3 * Hp).astype(jnp.float32)
    return wx_p, wh_k, wh_p, b_p


def _bf(a):
    # Round-trip through bf16 to mirror the kernel's MXU / streamed dtypes.
    return a.astype(jnp.bfloat16).astype(jnp.float32)


def reference_cell(x, hx, cx, wx, wh, b):
    hi = jax.lax.Precision.HIGHEST
    gates = (jnp.dot(_bf(x), _bf(wx), precision=hi)
             + jnp.dot(_bf(hx), _bf(wh), precision=hi) + b)
    H = hx.shape[-1]
    ingate = jax.nn.sigmoid(gates[:, :H])
    gategate = jnp.tanh(gates[:, H:2 * H])
    outgate = jax.nn.sigmoid(gates[:, 2 * H:])
    cy = (1.0 - ingate) * cx + ingate * gategate
    hy = outgate * jnp.tanh(cy)
    return hy, cy


def reference_sequence(xs, h0, c0, wx, wh, b):
    """Mirrors the kernel numeric path: bf16 weights, bf16-stored xp, f32 state."""
    hi = jax.lax.Precision.HIGHEST
    T, B, I = xs.shape
    H = h0.shape[-1]
    xp = jnp.dot(_bf(xs.reshape(T * B, I)), _bf(wx), precision=hi) + b
    xp = _bf(xp).reshape(T, B, 3 * H)
    h, c = h0, c0
    hs, cs = [], []
    for t in range(T):
        gates = xp[t] + jnp.dot(_bf(h), _bf(wh), precision=hi)
        ingate = jax.nn.sigmoid(gates[:, :H])
        gategate = jnp.tanh(gates[:, H:2 * H])
        outgate = jax.nn.sigmoid(gates[:, 2 * H:])
        c = (1.0 - ingate) * c + ingate * gategate
        h = outgate * jnp.tanh(c)
        hs.append(h)
        cs.append(c)
    return jnp.stack(hs), jnp.stack(cs)


if __name__ == "__main__":
    input_size, hidden_size, batch, seq_len = 16, 32, 8, 16

    key = jax.random.PRNGKey(0)
    kp, kx, kh, kc, ks = jax.random.split(key, 5)

    wx, wh, b = init_params(kp, input_size, hidden_size)
    wx_p, wh_k, wh_p, b_p = pack_params(wx, wh, b, hidden_size)

    x = jax.random.normal(kx, (batch, input_size), jnp.float32)
    hx = jax.random.normal(kh, (batch, hidden_size), jnp.float32)
    cx = jax.random.normal(kc, (batch, hidden_size), jnp.float32)

    # --- single step (exactly the module's forward) ---
    hy, cy = cifg_cell(x, hx, cx, wx_p, wh_k, b_p, hidden_size)
    jax.block_until_ready((hy, cy))
    hy_r, cy_r = reference_cell(x, hx, cx, wx, wh, b)
    assert jnp.allclose(hy, hy_r, atol=2e-4, rtol=2e-4), "single-step hy mismatch"
    assert jnp.allclose(cy, cy_r, atol=2e-4, rtol=2e-4), "single-step cy mismatch"

    # --- sequence: chunked time grid, resident Wh, bf16 streamed I/O ---
    xs = jax.random.normal(ks, (seq_len, batch, input_size), jnp.float32)
    hs, cs = cifg_sequence(xs, hx, cx, wx_p, wh_p, b_p, hidden_size)
    jax.block_until_ready((hs, cs))
    hs_r, cs_r = reference_sequence(xs, hx, cx, wx, wh, b)
    assert jnp.allclose(hs.astype(jnp.float32), hs_r, atol=2e-2, rtol=2e-2), \
        "sequence hy mismatch"
    assert jnp.allclose(cs.astype(jnp.float32), cs_r, atol=2e-2, rtol=2e-2), \
        "sequence cy mismatch"

    print("KERNEL_OK")
</pallas_src>

<mosaic_0001>
module attributes {stable_mosaic.version = 11 : i64} {
  func.func @cifg_cell_kernel(%arg0: memref<8x16xf32, #tpu.memory_space<vmem>>, %arg1: memref<8x32xf32, #tpu.memory_space<vmem>>, %arg2: memref<8x32xf32, #tpu.memory_space<vmem>>, %arg3: memref<16x384xbf16, #tpu.memory_space<vmem>>, %arg4: memref<32x384xbf16, #tpu.memory_space<vmem>>, %arg5: memref<1x384xf32, #tpu.memory_space<vmem>>, %arg6: memref<8x32xf32, #tpu.memory_space<vmem>>, %arg7: memref<8x32xf32, #tpu.memory_space<vmem>>) attributes {dimension_semantics = [], scalar_prefetch = 0 : i64, scratch_operands = 0 : i64, tpu.core_type = #tpu.core_type<tc>} {
    %c0 = arith.constant 0 : index
    %c0_0 = arith.constant 0 : index
    %0 = vector.load %arg0[%c0, %c0_0] : memref<8x16xf32, #tpu.memory_space<vmem>>, vector<8x16xf32>
    %1 = arith.truncf %0 : vector<8x16xf32> to vector<8x16xbf16>
    %c0_1 = arith.constant 0 : index
    %c0_2 = arith.constant 0 : index
    %2 = vector.load %arg3[%c0_1, %c0_2] : memref<16x384xbf16, #tpu.memory_space<vmem>>, vector<16x384xbf16>
    %cst = arith.constant dense<0.000000e+00> : vector<8x384xf32>
    %3 = tpu.matmul %1, %2, %cst {dimension_numbers = #tpu.dot_dimension_numbers<[1], [0], [0], [1], [0, 0, 1, 1], [], []>} : vector<8x16xbf16>, vector<16x384xbf16>, vector<8x384xf32> -> vector<8x384xf32>
    %c0_3 = arith.constant 0 : index
    %c0_4 = arith.constant 0 : index
    %4 = vector.load %arg1[%c0_3, %c0_4] : memref<8x32xf32, #tpu.memory_space<vmem>>, vector<8x32xf32>
    %5 = arith.truncf %4 : vector<8x32xf32> to vector<8x32xbf16>
    %c0_5 = arith.constant 0 : index
    %c0_6 = arith.constant 0 : index
    %6 = vector.load %arg4[%c0_5, %c0_6] : memref<32x384xbf16, #tpu.memory_space<vmem>>, vector<32x384xbf16>
    %cst_7 = arith.constant dense<0.000000e+00> : vector<8x384xf32>
    %7 = tpu.matmul %5, %6, %cst_7 {dimension_numbers = #tpu.dot_dimension_numbers<[1], [0], [0], [1], [0, 0, 1, 1], [], []>} : vector<8x32xbf16>, vector<32x384xbf16>, vector<8x384xf32> -> vector<8x384xf32>
    %8 = arith.addf %3, %7 : vector<8x384xf32>
    %c0_8 = arith.constant 0 : index
    %c0_9 = arith.constant 0 : index
    %9 = vector.load %arg5[%c0_8, %c0_9] : memref<1x384xf32, #tpu.memory_space<vmem>>, vector<1x384xf32>
    %10 = vector.broadcast %9 : vector<1x384xf32> to vector<8x384xf32>
    %11 = arith.addf %8, %10 : vector<8x384xf32>
    %12 = vector.extract_strided_slice %11 {offsets = [0, 0], sizes = [8, 32], strides = [1, 1]} : vector<8x384xf32> to vector<8x32xf32>
    %13 = arith.negf %12 : vector<8x32xf32>
    %14 = math.exp %13 : vector<8x32xf32>
    %cst_10 = arith.constant 1.000000e+00 : f32
    %15 = vector.broadcast %cst_10 : f32 to vector<8x32xf32>
    %16 = arith.addf %15, %14 : vector<8x32xf32>
    %17 = arith.divf %15, %16 : vector<8x32xf32>
    %18 = vector.extract_strided_slice %11 {offsets = [0, 128], sizes = [8, 32], strides = [1, 1]} : vector<8x384xf32> to vector<8x32xf32>
    %19 = math.tanh %18 : vector<8x32xf32>
    %20 = vector.extract_strided_slice %11 {offsets = [0, 256], sizes = [8, 32], strides = [1, 1]} : vector<8x384xf32> to vector<8x32xf32>
    %21 = arith.negf %20 : vector<8x32xf32>
    %22 = math.exp %21 : vector<8x32xf32>
    %cst_11 = arith.constant 1.000000e+00 : f32
    %23 = vector.broadcast %cst_11 : f32 to vector<8x32xf32>
    %24 = arith.addf %23, %22 : vector<8x32xf32>
    %25 = arith.divf %23, %24 : vector<8x32xf32>
    %c0_12 = arith.constant 0 : index
    %c0_13 = arith.constant 0 : index
    %26 = vector.load %arg2[%c0_12, %c0_13] : memref<8x32xf32, #tpu.memory_space<vmem>>, vector<8x32xf32>
    %cst_14 = arith.constant 1.000000e+00 : f32
    %27 = vector.broadcast %cst_14 : f32 to vector<8x32xf32>
    %28 = arith.subf %27, %17 : vector<8x32xf32>
    %29 = arith.mulf %28, %26 : vector<8x32xf32>
    %30 = arith.mulf %17, %19 : vector<8x32xf32>
    %31 = arith.addf %29, %30 : vector<8x32xf32>
    %32 = math.tanh %31 : vector<8x32xf32>
    %33 = arith.mulf %25, %32 : vector<8x32xf32>
    %c0_15 = arith.constant 0 : index
    %c0_16 = arith.constant 0 : index
    %34 = vector.load %arg7[%c0_15, %c0_16] : memref<8x32xf32, #tpu.memory_space<vmem>>, vector<8x32xf32>
    tpu.vector_store %arg7[%c0_15, %c0_16], %31 {strides = array<i32>} : memref<8x32xf32, #tpu.memory_space<vmem>>, vector<8x32xf32>,
    %c0_17 = arith.constant 0 : index
    %c0_18 = arith.constant 0 : index
    %35 = vector.load %arg6[%c0_17, %c0_18] : memref<8x32xf32, #tpu.memory_space<vmem>>, vector<8x32xf32>
    tpu.vector_store %arg6[%c0_17, %c0_18], %33 {strides = array<i32>} : memref<8x32xf32, #tpu.memory_space<vmem>>, vector<8x32xf32>,
    return
  }
}

</mosaic_0001>

<bundles_post_ra>
// kernel: tpu_custom_call.1
= control target key start
LH: loop header
LB: loop body
LE: loop exit
PB: predicated region body
PF: predicated region fallthrough
CT: control target
= control target key end

     0   :  { %13 = vsyncpa [#allocation3], 0  ;;  %s677_s0 = inlined_call_operand.hbm [shape: f32[8,16], index: 0, kind: input, shape index: {}]   ;;  %s678_s1 = inlined_call_operand.hbm [shape: f32[8,32], index: 1, kind: input, shape index: {}]   ;;  %s679_s2 = inlined_call_operand.hbm [shape: f32[8,32], index: 2, kind: input, shape index: {}]   ;;  %s680_s3 = inlined_call_operand.hbm [shape: bf16[16,384], index: 3, kind: input, shape index: {}]   ;;  %s681_s4 = inlined_call_operand.hbm [shape: bf16[32,384], index: 4, kind: input, shape index: {}]   ;;  %s682_s5 = inlined_call_operand.vmem [shape: f32[1,384], index: 5, kind: input, shape index: {}]   ;;  %s683_s6 = inlined_call_operand.hbm [shape: f32[8,32], index: 6, kind: output, shape index: {0}]   ;;  %s684_s7 = inlined_call_operand.hbm [shape: f32[8,32], index: 7, kind: output, shape index: {1}]  }
   0x1   :  { %14 = vsyncpa [#allocation6], 0 }
   0x2   :  { %15 = vsyncpa [#allocation9], 0 }
   0x3   :  { %16 = vsyncpa [#allocation4], 0  ;;  %s34_s26 = sshll.u32 %s678_s1, 4  ;;  %s35_s26 = int_to_ptr.hbm [resolvable:$true] %s34_s26 }
   0x4   :  { %17 = vsyncpa [#allocation13], 0  ;;  %s596_s27 = smov [#allocation5]   ;;  %s55_s8 = sshll.u32 %s680_s3, 4  ;;  %s56_s8 = int_to_ptr.hbm [resolvable:$true] %s55_s8 }
   0x5   :  { %s36_s28 = sshll.u32 %s596_s27, 4  ;;  %s597_s9 = smov [#allocation8]   ;;  %s37_s28 = int_to_ptr.vmem [resolvable:$true] %s36_s28 }
   0x6   :  { %39 = dma.hbm_to_vmem [thread:$0]  %s35_s26, 128, %s37_s28, [#allocation6]  }
   0x7   :  { %s57_s10 = sshll.u32 %s597_s9, 4  ;;  %s598_s11 = smov 192   ;;  %s58_s10 = int_to_ptr.vmem [resolvable:$true] %s57_s10 }
   0x8   :  { %s599_s12 = smov 12   ;;  %s23_s1 = sshll.u32 %s677_s0, 4  ;;  %s24_s1 = int_to_ptr.hbm [resolvable:$true] %s23_s1 }
   0x9   :  { %63 = dma.hbm_to_vmem [thread:$0]  %s56_s8, 384, %s58_s10, [#allocation9], %s598_s11, %s598_s11, %s599_s12  }
   0xa   :  { %s600_s15 = smov [#allocation2]   ;;  %s45_s3 = sshll.u32 %s679_s2, 4  ;;  %s46_s3 = int_to_ptr.hbm [resolvable:$true] %s45_s3 }
   0xb   :  { %s25_s16 = sshll.u32 %s600_s15, 4  ;;  %s601_s19 = smov [#allocation7]   ;;  %s26_s16 = int_to_ptr.vmem [resolvable:$true] %s25_s16 }
   0xc   :  { %28 = dma.hbm_to_vmem [thread:$0]  %s24_s1, 128, %s26_s16, [#allocation3]  }
   0xd   :  { %s47_s20 = sshll.u32 %s601_s19, 4  ;;  %s68_s23 = sshll.u32 %s681_s4, 4  ;;  %s48_s20 = int_to_ptr.vmem [resolvable:$true] %s47_s20  ;;  %s69_s23 = int_to_ptr.hbm [resolvable:$true] %s68_s23 }
   0xe   :  { %50 = dma.hbm_to_vmem [thread:$0]  %s46_s3, 128, %s48_s20, [#allocation6]  }
   0xf   :  { %s602_s0 = smov [#allocation10]  }
  0x10   :  { %s70_s24 = sshll.u32 %s602_s0, 4  ;;  %s71_s24 = int_to_ptr.vmem [resolvable:$true] %s70_s24 }
  0x11   :  { %76 = dma.hbm_to_vmem [thread:$0]  %s69_s23, 768, %s71_s24, [#allocation9], %s598_s11, %s598_s11, %s599_s12  }
  0x12   :  { %586 = dma.done.wait [#allocation3], 128  }
  0x13   :  { %587 = vsyncadd [#allocation3], 4294967168 }
  0x14   :  { %588 = dma.done.wait [#allocation6], 256  }
  0x15   :  { %589 = vsyncadd [#allocation6], 4294967040 }
  0x16   :  { %590 = dma.done.wait [#allocation9], 1152  }
  0x17   :  { %591 = vsyncadd [#allocation9], 4294966144  ;;  %v358_v0 = vld [vmem:[#allocation10 + $0x18] sm:$0xf]  ;;  %v395_v1 = vld [vmem:[#allocation10 + $0x20] sm:$0xf0] }
  0x18   :  { %v373_v2 = vld [vmem:[#allocation8] sm:$0xf]  ;;  %v359_v3 = vor.u32 %v395_v1, %v358_v0  ;;  %v389_v4 = vld [vmem:[#allocation8 + $0x8] sm:$0xf0]  ;;  %v366_v5 = vld [vmem:[#allocation10 + $0x20] sm:$0xf] }
  0x19   :  { %v396_v6 = vld [vmem:[#allocation10 + $0x28] sm:$0xf0]  ;;  %v374_v7 = vor.u32 %v389_v4, %v373_v2  ;;  %v100_v9 = vld [vmem:[#allocation2] sm:$0xff]  ;;  %v346_v10 = vld [vmem:[#allocation10] sm:$0xf]  ;;  %vm207_vm0 = vcmask 130048  }
  0x1a   :  { %v367_v8 = vor.u32 %v396_v6, %v366_v5  ;;  %v392_v11 = vld [vmem:[#allocation10 + $0x8] sm:$0xf0]  ;;  %158 = vmatpush.bf16.msra.mxu0 %v359_v3  ;;  %v101_v12 = vpack.c.bf16 %v100_v9, %v100_v9  ;;  %v354_v14 = vld [vmem:[#allocation10 + $0x8] sm:$0xf]  ;;  %v393_v15 = vld [vmem:[#allocation10 + $0x10] sm:$0xf0] }
  0x1b   :  { %v347_v13 = vor.u32 %v392_v11, %v346_v10  ;;  %v106_v16 = vld [vmem:[#allocation5] sm:$0xff]  ;;  %218 = vmatpush.bf16.msra.mxu3 %v374_v7  ;;  %v355_v17 = vor.u32 %v393_v15, %v354_v14  ;;  %v381_v18 = vld [vmem:[#allocation8 + $0x8] sm:$0xf]  ;;  %v388_v20 = vld [vmem:[#allocation8 + $0x4] sm:$0xf]  ;;  %vm148_vm1 = vcmask 261120  }
  0x1c   :  { %184 = vmatpush.bf16.msra.mxu2 %v367_v8  ;;  %v390_v19 = vld [vmem:[#allocation8 + $0x10] sm:$0xf0]  ;;  %v375_v22 = vld [vmem:[#allocation8 + $0xc] sm:$0xf0]  ;;  %v360_v24 = vld [vmem:[#allocation10 + $0x24] sm:$0xf0]  ;;  %v107_v25 = vpack.c.bf16 %v106_v16, %v106_v16 }
  0x1d   :  { %v382_v21 = vor.u32 %v390_v19, %v381_v18  ;;  %v394_v23 = vld [vmem:[#allocation10 + $0x1c] sm:$0xf]  ;;  %v378_v26 = vor.u32 %v388_v20, %v375_v22  ;;  %v391_v28 = vld [vmem:[#allocation10 + $0x4] sm:$0xf]  ;;  %v348_v29 = vld [vmem:[#allocation10 + $0xc] sm:$0xf0] }
  0x1e   :  { %v363_v27 = vor.u32 %v394_v23, %v360_v24  ;;  %383 = vmatmul.msk.bf16.vlgmr.msra.gmra.mxu3 %vm207_vm0, %v101_v12  ;;  %159 = vmatpush.bf16.msra.mxu0 %v347_v13  ;;  %v351_v30 = vor.u32 %v391_v28, %v348_v29  ;;  %v250_v31 = vld [vmem:[%s682_s5] sm:$0x7]  ;;  %v300_v6 = vld [vmem:[#allocation7] sm:$0xff]  ;;  %s603_s5 = smov [#allocation12]   ;;  %s327_s28 = sshll.u32 %s684_s7, 4  ;;  %s328_s28 = int_to_ptr.hbm [resolvable:$true] %s327_s28 }
  0x1f   :  { %231 = vmatpush.bf16.msrb.mxu3 %v378_v26  ;;  %v252_v33 = vperm.slane %v250_v31, 0  ;;  %v254_v44 = vperm.slane %v250_v31, 2  ;;  %v253_v53 = vperm.slane %v250_v31, 1  ;;  %s325_s25 = sshll.u32 %s603_s5, 4  ;;  %s604_s7 = smov [#allocation11]   ;;  %s326_s25 = int_to_ptr.vmem [resolvable:$true] %s325_s25 }
  0x20   :  { %185 = vmatpush.bf16.msra.mxu2 %v355_v17  ;;  %171 = vmatpush.bf16.msra.mxu1 %v363_v27  ;;  %s314_s29 = sshll.u32 %s604_s7, 4  ;;  %s316_s9 = sshll.u32 %s683_s6, 4  ;;  %s315_s29 = int_to_ptr.vmem [resolvable:$true] %s314_s29  ;;  %s317_s9 = int_to_ptr.hbm [resolvable:$true] %s316_s9 }
  0x21   :  { %368 = vmatmul.msk.bf16.vlgmr.msra.gmra.mxu0 %vm148_vm1, %v107_v25 }
  0x22   :  { %244 = vmatpush.bf16.msrb.mxu0 %v382_v21 }
  0x23   :  { %370 = vmatmul.msk.bf16.vlgmr.msra.gmra.mxu2 %vm148_vm1, %v107_v25 }
  0x24   :  { %172 = vmatpush.bf16.msra.mxu1 %v351_v30 }
  0x27   :  { %369 = vmatmul.msk.bf16.vlgmr.msra.gmra.mxu1 %vm148_vm1, %v107_v25 }
  0x2e   :  { %384 = vmatmul.msk.bf16.vlgmr.msrb.gmra.mxu3 %vm207_vm0, %v101_v12 }
  0x31   :  { %385 = vmatmul.msk.bf16.vlgmr.msrb.gmra.mxu0 %vm207_vm0, %v101_v12 }
  0x9e   :  { %v161_v32 = vpop.f32.mrf.mxu0 }
  0xa1   :  { %v220_v34 = vpop.f32.mrf.mxu3 }
  0xa2   :  { %v221_v35 = vadd.f32 %v220_v34, %v161_v32 }
  0xa4   :  { %v258_v36 = vadd.f32 %v252_v33, %v221_v35  ;;  %v174_v37 = vpop.f32.mrf.mxu1 }
  0xa6   :  { %v187_v38 = vpop.f32.mrf.mxu2  ;;  %v386_v39 = vmul.f32 -1.442695, %v258_v36  ;;  %v163_v40 = vpop.f32.mrf.mxu0 }
  0xa8   :  { %406 = vpow2.f32 %v386_v39 }
  0xa9   :  { %v222_v41 = vpop.f32.mrf.mxu3 }
  0xac   :  { %v176_v42 = vpop.f32.mrf.mxu1 }
  0xae   :  { %v189_v43 = vpop.f32.mrf.mxu2  ;;  %v407_v45 = vpop.eup %406 }
  0xaf   :  { %v246_v46 = vpop.f32.mrf.mxu0  ;;  %v264_v47 = vadd.f32 1.0, %v407_v45 }
  0xb0   :  { %v247_v48 = vadd.f32 %v246_v46, %v187_v38 }
  0xb1   :  { %408 = vrcp.f32 %v264_v47  ;;  %v233_v50 = vpop.f32.mrf.mxu3  ;;  %v276_v61 = vand.u32 2147483648, %v264_v47  ;;  %v274_v0 = vand.u32 2147483647, %v264_v47  ;;  %vm270_vm3 = vweird.f32 %v264_v47 }
  0xb2   :  { %v260_v49 = vadd.f32 %v254_v44, %v247_v48  ;;  %v234_v52 = vadd.f32 %v233_v50, %v174_v37 }
  0xb3   :  { %v277_v2 = vor.u32 1.1754944e-38, %v276_v61  ;;  %vm275_vm5 = vcmp.eq.f32.partialorder %v274_v0, 8.507059e+37 }
  0xb4   :  { %v387_v51 = vmul.f32 -1.442695, %v260_v49  ;;  %v259_v56 = vadd.f32 %v253_v53, %v234_v52 }
  0xb6   :  { %410 = vpow2.f32 %v387_v51 }
  0xb7   :  { %v248_v54 = vpop.f32.mrf.mxu0  ;;  %v409_v55 = vpop.eup %408  ;;  %412 = vtanh.f32 %v259_v56 }
  0xb8   :  { %v266_v57 = vmul.f32 %v409_v55, %v264_v47  ;;  %vm271_vm2 = vweird.f32 %v409_v55 }
  0xb9   :  { %v235_v58 = vpop.f32.mrf.mxu3  ;;  %vm272_vm4 = vmor %vm270_vm3, %vm271_vm2 }
  0xba   :  { %v267_v59 = vsub.f32 1.0, %v266_v57 }
  0xbc   :  { %v411_v60 = vpop.eup %410  ;;  %v268_v63 = vmul.f32 %v409_v55, %v267_v59 }
  0xbd   :  { %v284_v62 = vadd.f32 1.0, %v411_v60  ;;  %v413_v4 = vpop.eup %412 }
  0xbe   :  { %v269_v1 = vadd.f32 %v409_v55, %v268_v63 }
  0xbf   :  { %414 = vrcp.f32 %v284_v62  ;;  %v296_v14 = vand.u32 2147483648, %v284_v62  ;;  %v294_v16 = vand.u32 2147483647, %v284_v62  ;;  %vm290_vm7 = vweird.f32 %v284_v62 }
  0xc0   :  { %v273_v3 = vsel %vm272_vm4, %v409_v55, %v269_v1 }
  0xc1   :  { %v278_v5 = vsel %vm275_vm5, %v277_v2, %v273_v3  ;;  %v297_v18 = vor.u32 1.1754944e-38, %v296_v14  ;;  %vm295_vm9 = vcmp.eq.f32.partialorder %v294_v16, 8.507059e+37 }
  0xc2   :  { %v301_v7 = vsub.f32 1.0, %v278_v5  ;;  %v303_v10 = vmul.f32 %v413_v4, %v278_v5 }
  0xc4   :  { %v302_v9 = vmul.f32 %v301_v7, %v300_v6 }
  0xc5   :  { %v415_v8 = vpop.eup %414 }
  0xc6   :  { %v286_v11 = vmul.f32 %v415_v8, %v284_v62  ;;  %v304_v12 = vadd.f32 %v303_v10, %v302_v9  ;;  %vm291_vm6 = vweird.f32 %v415_v8 }
  0xc7   :  { %vm292_vm8 = vmor %vm290_vm7, %vm291_vm6 }
  0xc8   :  { %v287_v13 = vsub.f32 1.0, %v286_v11  ;;  %416 = vtanh.f32 %v304_v12  ;;  %307 = vst.msk [vmem:[#allocation12] sm:$0xff] %vm148_vm1, %v304_v12 }
  0xc9   :  { %330 = dma.vmem_to_hbm [thread:$0]  %s326_s25, 128, %s328_s28, [#allocation13]  }
  0xca   :  { %v288_v15 = vmul.f32 %v415_v8, %v287_v13 }
  0xcc   :  { %v289_v17 = vadd.f32 %v415_v8, %v288_v15 }
  0xce   :  { %v293_v19 = vsel %vm292_vm8, %v415_v8, %v289_v17  ;;  %v417_v20 = vpop.eup %416 }
  0xcf   :  { %v298_v21 = vsel %vm295_vm9, %v297_v18, %v293_v19 }
  0xd0   :  { %v306_v22 = vmul.f32 %v417_v20, %v298_v21 }
  0xd2   :  { %308 = vst.msk [vmem:[#allocation11] sm:$0xff] %vm148_vm1, %v306_v22 }
  0xd3   :  { %319 = dma.vmem_to_hbm [thread:$0]  %s315_s29, 128, %s317_s9, [#allocation4]  }
  0xd4   :  { %592 = dma.done.wait [#allocation4], 128  }
  0xd5   :  { %593 = vsyncadd [#allocation4], 4294967168 }
  0xd6   :  { %594 = dma.done.wait [#allocation13], 128  }
  0xd7   :  { %595 = vsyncadd [#allocation13], 4294967168 }
  0xd8   :  { %339 = vsyncpa [#allocation3], 1 }
  0xd9   :  { %340 = vsyncpa [#allocation6], 1 }
  0xda   :  { %341 = vsyncpa [#allocation9], 1 }
  0xdb   :  { %342 = vsyncpa [#allocation4], 1 }
  0xdc   :  { %343 = vsyncpa [#allocation13], 1 }

</bundles_post_ra>
